<compile_context>
chip_gen: v7x
topology: tpu7x:2x2x1
jax: 0.10.0
libtpu: 0.0.40
codegen_flags: <defaults>
</compile_context>

<pallas_src>
import math

import jax
import jax.numpy as jnp
from jax.experimental import pallas as pl
from jax.experimental.pallas import tpu as pltpu


def _round_up(x, m):
    return ((x + m - 1) // m) * m


def _choose_tile(requested, n, min_tile):
    """Largest power-of-two tile <= requested that does not grossly exceed n."""
    t = min_tile
    while t < requested and t < n:
        t *= 2
    return t


# ----------------------------- fused GCN kernel ------------------------------

def gcn_fused_kernel(a_ref, x_ref, w_ref, dinv_ref, b_ref, o_ref):
    k = pl.program_id(1)

    @pl.when(k == 0)
    def _():
        o_ref[...] = jnp.zeros_like(o_ref)

    # Tiny-K feature transform for this src tile (recomputed per dst tile;
    # ~c_in/tm extra flops, but saves the H round trip through HBM).
    h = jnp.dot(x_ref[...], w_ref[...], preferred_element_type=jnp.float32)

    # bf16 x bf16 on the MXU, f32 accumulation directly into the resident
    # output block (its block index is constant across the reduction axis).
    o_ref[...] += jnp.dot(a_ref[...], h.astype(jnp.bfloat16),
                          preferred_element_type=jnp.float32)

    @pl.when(k == pl.num_programs(1) - 1)
    def _():
        o_ref[...] = jnp.maximum(o_ref[...] * dinv_ref[...] + b_ref[...], 0.0)


def gcn_conv_relu(edge_index, x, w, b, *, tm=512, tk=1024):
    """relu(D^-1/2 (A+I) D^-1/2 @ (X @ W) + b) as one fused Pallas kernel."""
    n, c_in = x.shape
    c_out = w.shape[1]
    c_pad = _round_up(c_out, 128)

    # Power-of-two tiles; dst axis padded to tm, src/reduction axis to tk
    # independently (no lcm blow-up). tm is a multiple of 16 (bf16 sublanes).
    tm = _choose_tile(tm, n, 16)
    tk = _choose_tile(tk, n, 128)
    # Keep >=2 dst tiles when possible so v7x's 2nd TensorCore has work.
    if _round_up(n, tm) // tm < 2 and tm > 16:
        tm //= 2
    n_dst_pad = _round_up(n, tm)
    n_src_pad = _round_up(n, tk)

    # ---------------- cheap O(E) / O(N*c_in) glue (no extra O(N^2) passes) ----
    src, dst = edge_index[0], edge_index[1]
    loops = jnp.arange(n, dtype=edge_index.dtype)
    src_all = jnp.concatenate([src, loops])
    dst_all = jnp.concatenate([dst, loops])

    # Raw (A + I) counts, built directly at padded shape in bf16 (exact ints).
    ones = jnp.ones(src_all.shape, jnp.bfloat16)
    a_p = jnp.zeros((n_dst_pad, n_src_pad), jnp.bfloat16).at[
        dst_all, src_all].add(ones)

    # Degrees from edges (exact, f32): in-degree + 1 self loop.
    deg = jnp.zeros((n,), jnp.float32).at[dst].add(1.0) + 1.0
    dinv = 1.0 / jnp.sqrt(deg)

    # Fold d^-1/2[src] into X; pad. d^-1/2[dst] applied in the kernel epilogue.
    x_scaled = dinv[:, None] * x.astype(jnp.float32)
    x_p = jnp.zeros((n_src_pad, c_in), jnp.float32).at[:n, :].set(x_scaled)
    dinv_dst_p = jnp.zeros((n_dst_pad, 1), jnp.float32).at[:n, 0].set(dinv)

    w_p = jnp.zeros((c_in, c_pad), jnp.float32).at[:, :c_out].set(w)
    b_p = jnp.zeros((1, c_pad), jnp.float32).at[0, :c_out].set(b)

    # ------------------------------ pallas_call -------------------------------
    grid_i = n_dst_pad // tm
    grid_k = n_src_pad // tk
    grid = (grid_i, grid_k)

    flops = 2 * n_dst_pad * n_src_pad * c_pad \
        + 2 * grid_i * n_src_pad * c_in * c_pad
    bytes_accessed = (a_p.size * 2                          # A streamed once
                      + grid_i * x_p.size * 4               # X per dst tile
                      + grid_i * grid_k * (w_p.size + b_p.size + tm) * 4
                      + n_dst_pad * c_pad * 4)              # output

    out = pl.pallas_call(
        gcn_fused_kernel,
        out_shape=jax.ShapeDtypeStruct((n_dst_pad, c_pad), jnp.float32),
        grid_spec=pltpu.PrefetchScalarGridSpec(
            num_scalar_prefetch=0,
            grid=grid,
            in_specs=[
                pl.BlockSpec((tm, tk), lambda i, k: (i, k)),      # A tile
                pl.BlockSpec((tk, c_in), lambda i, k: (k, 0)),    # X tile
                pl.BlockSpec((c_in, c_pad), lambda i, k: (0, 0)),  # W (const)
                pl.BlockSpec((tm, 1), lambda i, k: (i, 0)),       # dinv_dst
                pl.BlockSpec((1, c_pad), lambda i, k: (0, 0)),    # bias
            ],
            out_specs=pl.BlockSpec((tm, c_pad), lambda i, k: (i, 0)),
        ),
        compiler_params=pltpu.CompilerParams(
            dimension_semantics=("parallel", "arbitrary"),
            vmem_limit_bytes=32 * 1024 * 1024),
        cost_estimate=pl.CostEstimate(
            flops=flops, transcendentals=0, bytes_accessed=bytes_accessed),
    )(a_p, x_p, w_p, dinv_dst_p, b_p)

    return out[:n, :c_out]


# ------------------------------ reference glue --------------------------------

def build_normalized_adjacency(edge_index, num_nodes):
    """Dense A_hat = D^-1/2 (A + I) D^-1/2 (plain JAX, for the reference check)."""
    src, dst = edge_index[0], edge_index[1]
    loops = jnp.arange(num_nodes, dtype=edge_index.dtype)
    src = jnp.concatenate([src, loops])
    dst = jnp.concatenate([dst, loops])
    adj = jnp.zeros((num_nodes, num_nodes), jnp.float32).at[dst, src].add(1.0)
    deg = jnp.sum(adj, axis=1)
    dinv = jnp.where(deg > 0, 1.0 / jnp.sqrt(deg), 0.0)
    return dinv[:, None] * adj * dinv[None, :]


class GATNetPallas:
    """GATNet(in_channels, out_channels): a single GCNConv followed by ReLU."""

    def __init__(self, in_channels, out_channels, key):
        kw, _ = jax.random.split(key)
        limit = (6.0 / (in_channels + out_channels)) ** 0.5
        self.weight = jax.random.uniform(
            kw, (in_channels, out_channels), jnp.float32, -limit, limit)
        self.bias = jnp.zeros((out_channels,), jnp.float32)

    def __call__(self, x, edge_index):
        return gcn_conv_relu(edge_index, x.astype(jnp.float32),
                             self.weight, self.bias)


if __name__ == "__main__":
    key = jax.random.PRNGKey(0)
    k_x, k_e, k_p = jax.random.split(key, 3)

    num_nodes = 16
    in_channels = 8
    out_channels = 32
    num_edges = 40

    x = jax.random.normal(k_x, (num_nodes, in_channels), jnp.float32)
    edge_index = jax.random.randint(k_e, (2, num_edges), 0, num_nodes, jnp.int32)

    model = GATNetPallas(in_channels, out_channels, k_p)
    out = model(x, edge_index)
    out = jax.block_until_ready(out)

    # Sanity check against the f32 plain-JAX reference (tolerance loosened for
    # the bf16 A / H streaming path through the MXU).
    a_hat = build_normalized_adjacency(edge_index, num_nodes)
    ref = jnp.maximum(a_hat @ (x @ model.weight) + model.bias[None, :], 0.0)
    assert out.shape == (num_nodes, out_channels)
    assert jnp.allclose(out, ref, atol=2e-2, rtol=2e-2), \
        float(jnp.max(jnp.abs(out - ref)))

    print("KERNEL_OK")
</pallas_src>

<mosaic_0001>
module attributes {stable_mosaic.version = 11 : i64} {
  func.func @gcn_fused_kernel(%arg0: i32, %arg1: i32, %arg2: memref<16x128xbf16, #tpu.memory_space<vmem>>, %arg3: memref<128x8xf32, #tpu.memory_space<vmem>>, %arg4: memref<8x128xf32, #tpu.memory_space<vmem>>, %arg5: memref<16x1xf32, #tpu.memory_space<vmem>>, %arg6: memref<1x128xf32, #tpu.memory_space<vmem>>, %arg7: memref<16x128xf32, #tpu.memory_space<vmem>>) attributes {dimension_semantics = [#tpu.dimension_semantics<parallel>, #tpu.dimension_semantics<arbitrary>], iteration_bounds = array<i64: 1, 1>, scalar_prefetch = 0 : i64, scratch_operands = 0 : i64, tpu.core_type = #tpu.core_type<tc>, window_params = [{transform_indices = @transform_0, window_bounds = array<i64: 16, 128>}, {transform_indices = @transform_1, window_bounds = array<i64: 128, 8>}, {pipeline_mode = #tpu.pipeline_mode<synchronous>, transform_indices = @transform_2, window_bounds = array<i64: 8, 128>}, {transform_indices = @transform_3, window_bounds = array<i64: 16, 1>}, {pipeline_mode = #tpu.pipeline_mode<synchronous>, transform_indices = @transform_4, window_bounds = array<i64: 1, 128>}, {transform_indices = @transform_5, window_bounds = array<i64: 16, 128>}]} {
    %c0_i32 = arith.constant 0 : i32
    %0 = arith.cmpi eq, %arg1, %c0_i32 : i32
    %1 = arith.extui %0 : i1 to i32
    %c0_i32_0 = arith.constant 0 : i32
    %2 = arith.cmpi ne, %1, %c0_i32_0 : i32
    scf.if %2 {
      %cst_13 = arith.constant 0.000000e+00 : f32
      %15 = vector.broadcast %cst_13 : f32 to vector<16x128xf32>
      %c0_14 = arith.constant 0 : index
      %c0_15 = arith.constant 0 : index
      %16 = vector.load %arg7[%c0_14, %c0_15] : memref<16x128xf32, #tpu.memory_space<vmem>>, vector<16x128xf32>
      tpu.vector_store %arg7[%c0_14, %c0_15], %15 {strides = array<i32>} : memref<16x128xf32, #tpu.memory_space<vmem>>, vector<16x128xf32>,
    } else {
    }
    %c0 = arith.constant 0 : index
    %c0_1 = arith.constant 0 : index
    %3 = vector.load %arg3[%c0, %c0_1] : memref<128x8xf32, #tpu.memory_space<vmem>>, vector<128x8xf32>
    %c0_2 = arith.constant 0 : index
    %c0_3 = arith.constant 0 : index
    %4 = vector.load %arg4[%c0_2, %c0_3] : memref<8x128xf32, #tpu.memory_space<vmem>>, vector<8x128xf32>
    %cst = arith.constant dense<0.000000e+00> : vector<128x128xf32>
    %5 = tpu.matmul %3, %4, %cst {dimension_numbers = #tpu.dot_dimension_numbers<[1], [0], [0], [1], [0, 0, 1, 1], [], []>} : vector<128x8xf32>, vector<8x128xf32>, vector<128x128xf32> -> vector<128x128xf32>
    %c0_4 = arith.constant 0 : index
    %c0_5 = arith.constant 0 : index
    %6 = vector.load %arg7[%c0_4, %c0_5] : memref<16x128xf32, #tpu.memory_space<vmem>>, vector<16x128xf32>
    %c0_6 = arith.constant 0 : index
    %c0_7 = arith.constant 0 : index
    %7 = vector.load %arg2[%c0_6, %c0_7] : memref<16x128xbf16, #tpu.memory_space<vmem>>, vector<16x128xbf16>
    %8 = arith.truncf %5 : vector<128x128xf32> to vector<128x128xbf16>
    %cst_8 = arith.constant dense<0.000000e+00> : vector<16x128xf32>
    %9 = tpu.matmul %7, %8, %cst_8 {dimension_numbers = #tpu.dot_dimension_numbers<[1], [0], [0], [1], [0, 0, 1, 1], [], []>} : vector<16x128xbf16>, vector<128x128xbf16>, vector<16x128xf32> -> vector<16x128xf32>
    %10 = arith.addf %6, %9 : vector<16x128xf32>
    %c0_9 = arith.constant 0 : index
    %c0_10 = arith.constant 0 : index
    %11 = vector.load %arg7[%c0_9, %c0_10] : memref<16x128xf32, #tpu.memory_space<vmem>>, vector<16x128xf32>
    tpu.vector_store %arg7[%c0_9, %c0_10], %10 {strides = array<i32>} : memref<16x128xf32, #tpu.memory_space<vmem>>, vector<16x128xf32>,
    %c0_i32_11 = arith.constant 0 : i32
    %12 = arith.cmpi eq, %arg1, %c0_i32_11 : i32
    %13 = arith.extui %12 : i1 to i32
    %c0_i32_12 = arith.constant 0 : i32
    %14 = arith.cmpi ne, %13, %c0_i32_12 : i32
    scf.if %14 {
      %c0_13 = arith.constant 0 : index
      %c0_14 = arith.constant 0 : index
      %15 = vector.load %arg7[%c0_13, %c0_14] : memref<16x128xf32, #tpu.memory_space<vmem>>, vector<16x128xf32>
      %c0_15 = arith.constant 0 : index
      %c0_16 = arith.constant 0 : index
      %16 = vector.load %arg5[%c0_15, %c0_16] : memref<16x1xf32, #tpu.memory_space<vmem>>, vector<16x1xf32>
      %17 = vector.broadcast %16 : vector<16x1xf32> to vector<16x128xf32>
      %18 = arith.mulf %15, %17 : vector<16x128xf32>
      %c0_17 = arith.constant 0 : index
      %c0_18 = arith.constant 0 : index
      %19 = vector.load %arg6[%c0_17, %c0_18] : memref<1x128xf32, #tpu.memory_space<vmem>>, vector<1x128xf32>
      %20 = vector.broadcast %19 : vector<1x128xf32> to vector<16x128xf32>
      %21 = arith.addf %18, %20 : vector<16x128xf32>
      %cst_19 = arith.constant 0.000000e+00 : f32
      %22 = vector.broadcast %cst_19 : f32 to vector<16x128xf32>
      %23 = arith.maximumf %21, %22 : vector<16x128xf32>
      %c0_20 = arith.constant 0 : index
      %c0_21 = arith.constant 0 : index
      %24 = vector.load %arg7[%c0_20, %c0_21] : memref<16x128xf32, #tpu.memory_space<vmem>>, vector<16x128xf32>
      tpu.vector_store %arg7[%c0_20, %c0_21], %23 {strides = array<i32>} : memref<16x128xf32, #tpu.memory_space<vmem>>, vector<16x128xf32>,
    } else {
    }
    return
  }
  func.func @transform_0(%arg0: i32, %arg1: i32) -> (i32, i32) {
    %c0_i32 = arith.constant 0 : i32
    return %arg0, %arg1 : i32, i32
  }
  func.func @transform_1(%arg0: i32, %arg1: i32) -> (i32, i32) {
    %c0_i32 = arith.constant 0 : i32
    %c0_i32_0 = arith.constant 0 : i32
    return %arg1, %c0_i32 : i32, i32
  }
  func.func @transform_2(%arg0: i32, %arg1: i32) -> (i32, i32) {
    %c0_i32 = arith.constant 0 : i32
    %c0_i32_0 = arith.constant 0 : i32
    %c0_i32_1 = arith.constant 0 : i32
    return %c0_i32, %c0_i32_0 : i32, i32
  }
  func.func @transform_3(%arg0: i32, %arg1: i32) -> (i32, i32) {
    %c0_i32 = arith.constant 0 : i32
    %c0_i32_0 = arith.constant 0 : i32
    return %arg0, %c0_i32 : i32, i32
  }
  func.func @transform_4(%arg0: i32, %arg1: i32) -> (i32, i32) {
    %c0_i32 = arith.constant 0 : i32
    %c0_i32_0 = arith.constant 0 : i32
    %c0_i32_1 = arith.constant 0 : i32
    return %c0_i32, %c0_i32_0 : i32, i32
  }
  func.func @transform_5(%arg0: i32, %arg1: i32) -> (i32, i32) {
    %c0_i32 = arith.constant 0 : i32
    %c0_i32_0 = arith.constant 0 : i32
    return %arg0, %c0_i32 : i32, i32
  }
}

</mosaic_0001>

<bundles_post_ra>
// kernel: tpu_custom_call.1
= control target key start
LH: loop header
LB: loop body
LE: loop exit
PB: predicated region body
PF: predicated region fallthrough
CT: control target
= control target key end

     0   :  { %vm45_vm0 = vcmask 64512   ;;  %s599_s0 = inlined_call_operand.vmem [shape: bf16[16,128], index: 0, kind: input, shape index: {}]   ;;  %s600_s1 = inlined_call_operand.vmem [shape: f32[128,8], index: 1, kind: input, shape index: {}]   ;;  %s601_s2 = inlined_call_operand.vmem [shape: f32[8,128], index: 2, kind: input, shape index: {}]   ;;  %s602_s3 = inlined_call_operand.vmem [shape: f32[16,1], index: 3, kind: input, shape index: {}]   ;;  %s603_s4 = inlined_call_operand.vmem [shape: f32[1,128], index: 4, kind: input, shape index: {}]   ;;  %s604_s5 = inlined_call_operand.hbm [shape: f32[16,128], index: 5, kind: output, shape index: {}]  }
   0x1   :  { %v44_v0 = vld [vmem:[%s601_s2] sm:$0xff]  ;;  %v29_v2 = vld [vmem:[%s600_s1 + $0x8] sm:$0xff]  ;;  %v30_v3 = vld [vmem:[%s600_s1 + $0x10] sm:$0xff] }
   0x2   :  { %v28_v1 = vld [vmem:[%s600_s1] sm:$0xff]  ;;  %394 = vmatprep.subr.mxu0 %v44_v0  ;;  %v31_v4 = vld [vmem:[%s600_s1 + $0x18] sm:$0xff] }
   0x3   :  { %396 = vmatprep.mubr.msk.f32.mxu0 %vm45_vm0, %v28_v1  ;;  %395 = vmatpush3.msra.mxu0 %v44_v0  ;;  %v32_v5 = vld [vmem:[%s600_s1 + $0x20] sm:$0xff] }
   0x4   :  { %397 = vmatmul.mubr.msk.f32.vlgmr.msra.gmra.mrb[0].mxu0 %vm45_vm0, %v29_v2 }
   0x5   :  { %399 = vmatprep.mubr.msk.f32.mxu0 %vm45_vm0, %v30_v3 }
   0x6   :  { %10 = vsyncpa [#allocation3], 0  ;;  %v33_v6 = vld [vmem:[%s600_s1 + $0x28] sm:$0xff]  ;;  %v34_v7 = vld [vmem:[%s600_s1 + $0x30] sm:$0xff]  ;;  %v472_v17 = vmov 0.0   ;;  %vm473_vm1 = vmmov 0  }
   0x7   :  { %v35_v8 = vld [vmem:[%s600_s1 + $0x38] sm:$0xff]  ;;  %v36_v9 = vld [vmem:[%s600_s1 + $0x40] sm:$0xff]  ;;  %v37_v10 = vld [vmem:[%s600_s1 + $0x48] sm:$0xff]  ;;  %420 = vmatprep.subr.bf16.mxu1 %v472_v17  ;;  %436 = vmatprep.mubr.msk.bf16.mxu1 %vm473_vm1, %v472_v17  ;;  %v474_v19 = vmov 0   ;;  %s475_s6 = smov [#allocation2]  }
   0x8   :  { %400 = vmatmul.mubr.msk.f32.gmra.mrb[2].mxu0 %vm45_vm0, %v31_v4  ;;  %v38_v11 = vld [vmem:[%s600_s1 + $0x50] sm:$0xff]  ;;  %v39_v12 = vld [vmem:[%s600_s1 + $0x58] sm:$0xff]  ;;  %v40_v13 = vld [vmem:[%s600_s1 + $0x60] sm:$0xff]  ;;  %446 = vset.pattern.permute.xlu0 %v474_v19  ;;  %s339_s7 = sshll.u32 %s475_s6, 4  ;;  %s340_s7 = int_to_ptr.vmem [resolvable:$true] %s339_s7 }
   0x9   :  { %402 = vmatprep.mubr.msk.f32.mxu0 %vm45_vm0, %v32_v5  ;;  %v41_v14 = vld [vmem:[%s600_s1 + $0x68] sm:$0xff]  ;;  %v42_v15 = vld [vmem:[%s600_s1 + $0x70] sm:$0xff]  ;;  %v43_v16 = vld [vmem:[%s600_s1 + $0x78] sm:$0xff]  ;;  %p453_p1 = scmp.lt.s32.totalorder %s340_s7, %s340_s7 }
   0xa   :  { %v307_v18 = vld [vmem:[%s602_s3] sm:$0xff]  ;;  %v308_v20 = vld [vmem:[%s602_s3 + $0x8] sm:$0xff] }
   0xb   :  { %311 = vperm.xlu0 %446, %v307_v18   ;;  %v447_v45 = vld [vmem:[%s599_s0] sm:$0xff]   ;;  %s448_s0 = scalar_lea.vmem %s340_s7, 256 }
   0xc   :  { %403 = vmatmul.mubr.msk.f32.gmra.mrb[4].mxu0 %vm45_vm0, %v33_v6  ;;  %v367_v50 = vld [vmem:[%s603_s4] ss:$0 sm:$0xff]  ;;  %p449_p0 = scmp.ne.s32.totalorder %s340_s7, %s448_s0  ;;  %p454_p2 = scmp.lt.s32.totalorder %s448_s0, %s448_s0 }
   0xd   :  { %405 = vmatprep.mubr.msk.f32.mxu0 %vm45_vm0, %v34_v7 }
   0xe   :  { %p455_p3 = por %p454_p2, %p453_p1 }
   0xf   :  { %316 = vperm.xlu0 %446, %v308_v20  }
  0x10   :  { %406 = vmatmul.mubr.msk.f32.gmra.mrb[6].mxu0 %vm45_vm0, %v35_v8  ;;  %p456_p4 = pnand %p455_p3, %p449_p0 }
  0x11   :  { %408 = vmatprep.mubr.msk.f32.mxu0 %vm45_vm0, %v36_v9 }
  0x14   :  { %409 = vmatmul.mubr.msk.f32.gmra.mrb[8].mxu0 %vm45_vm0, %v37_v10 }
  0x15   :  { %411 = vmatprep.mubr.msk.f32.mxu0 %vm45_vm0, %v38_v11 }
  0x18   :  { %412 = vmatmul.mubr.msk.f32.gmra.mrb[10].mxu0 %vm45_vm0, %v39_v12 }
  0x19   :  { %414 = vmatprep.mubr.msk.f32.mxu0 %vm45_vm0, %v40_v13 }
  0x1c   :  { %415 = vmatmul.mubr.msk.f32.gmra.mrb[12].mxu0 %vm45_vm0, %v41_v14 }
  0x1d   :  { %417 = vmatprep.mubr.msk.f32.mxu0 %vm45_vm0, %v42_v15 }
  0x20   :  { %418 = vmatmul.mubr.msk.f32.gmra.mrb[14].mxu0 %vm45_vm0, %v43_v16 }
  0x8a   :  { %v312_v46 = vpop.permute.xlu0 %311 }
  0x8e   :  { %v317_v53 = vpop.permute.xlu0 %316 }
  0xd7   :  { %v398_v21 = vpop.f32.mrb[0].mxu0 }
  0xd8   :  { %v160_v22 = vpop.f32.mrb[1].mxu0 }
  0xd9   :  { %v243_v23 = vpack.c.bf16 %v398_v21, %v160_v22 }
  0xdb   :  { %v401_v24 = vpop.f32.mrb[2].mxu0  ;;  %421 = vmatpush3.bf16.msra.mxu1 %v243_v23 }
  0xdc   :  { %v170_v25 = vpop.f32.mrb[3].mxu0  ;;  %422 = vmatprep.subr.bf16.mxu1 %v472_v17 }
  0xdd   :  { %v244_v26 = vpack.c.bf16 %v401_v24, %v170_v25 }
  0xdf   :  { %v404_v27 = vpop.f32.mrb[4].mxu0  ;;  %423 = vmatpush3.bf16.msra.mxu1 %v244_v26 }
  0xe0   :  { %v180_v28 = vpop.f32.mrb[5].mxu0  ;;  %424 = vmatprep.subr.bf16.mxu1 %v472_v17 }
  0xe1   :  { %v245_v29 = vpack.c.bf16 %v404_v27, %v180_v28 }
  0xe3   :  { %v407_v30 = vpop.f32.mrb[6].mxu0  ;;  %425 = vmatpush3.bf16.msra.mxu1 %v245_v29 }
  0xe4   :  { %v190_v31 = vpop.f32.mrb[7].mxu0  ;;  %426 = vmatprep.subr.bf16.mxu1 %v472_v17 }
  0xe5   :  { %v246_v32 = vpack.c.bf16 %v407_v30, %v190_v31 }
  0xe7   :  { %v410_v33 = vpop.f32.mrb[8].mxu0  ;;  %427 = vmatpush3.bf16.msra.mxu1 %v246_v32 }
  0xe8   :  { %v200_v34 = vpop.f32.mrb[9].mxu0  ;;  %428 = vmatprep.subr.bf16.mxu1 %v472_v17 }
  0xe9   :  { %v247_v35 = vpack.c.bf16 %v410_v33, %v200_v34 }
  0xeb   :  { %v413_v36 = vpop.f32.mrb[10].mxu0  ;;  %429 = vmatpush3.bf16.msra.mxu1 %v247_v35 }
  0xec   :  { %v210_v37 = vpop.f32.mrb[11].mxu0  ;;  %430 = vmatprep.subr.bf16.mxu1 %v472_v17 }
  0xed   :  { %v248_v38 = vpack.c.bf16 %v413_v36, %v210_v37 }
  0xef   :  { %v416_v39 = vpop.f32.mrb[12].mxu0  ;;  %431 = vmatpush3.bf16.msra.mxu1 %v248_v38 }
  0xf0   :  { %v220_v40 = vpop.f32.mrb[13].mxu0  ;;  %432 = vmatprep.subr.bf16.mxu1 %v472_v17 }
  0xf1   :  { %v249_v41 = vpack.c.bf16 %v416_v39, %v220_v40 }
  0xf3   :  { %v419_v42 = vpop.f32.mrb[14].mxu0  ;;  %433 = vmatpush3.bf16.msra.mxu1 %v249_v41 }
  0xf4   :  { %v230_v43 = vpop.f32.mrb[15].mxu0  ;;  %434 = vmatprep.subr.bf16.mxu1 %v472_v17 }
  0xf5   :  { %v250_v44 = vpack.c.bf16 %v419_v42, %v230_v43 }
  0xf7   :  { %435 = vmatpush3.bf16.msra.mxu1 %v250_v44 }
  0xfa   :  { %437 = vmatmul.mubr.bf16.vlgmr.msra.gmra.mrb[0].mxu1 %v447_v45 }
 0x1cd   :  { %v291_v47 = vpop.f32.mrb[0].mxu1 }
 0x1ce   :  { %v438_v48 = vpop.f32.mrb[1].mxu1  ;;  %v319_v52 = vmul.f32 %v312_v46, %v291_v47 }
 0x1cf   :  { %v294_v49 = vpop.f32.mrb[2].mxu1 }
 0x1d0   :  { %v439_v51 = vpop.f32.mrb[3].mxu1  ;;  %v328_v54 = vadd.f32 %v367_v50, %v319_v52  ;;  %v320_v55 = vmul.f32 %v317_v53, %v294_v49 }
 0x1d2   :  { %v330_v56 = vmax.f32 %v328_v54, 0.0  ;;  %v329_v57 = vadd.f32 %v367_v50, %v320_v55 }
 0x1d4   :  { %332 = vst [vmem:[#allocation2] sm:$0xff] %v330_v56  ;;  %v331_v58 = vmax.f32 %v329_v57, 0.0 }
 0x1d6   :  { %333 = vst [vmem:[#allocation2 + $0x8] sm:$0xff] %v331_v58 }
 0x1d7   :  { %459 = shalt.err (!%p456_p4)
}
 0x1d8   :  { %s460_s9 = scalar_lea.hbm %s604_s5, 256 }
 0x1d9   :  { %p461_p5 = scmp.ne.s32.totalorder %s604_s5, %s460_s9  ;;  %p464_p6 = scmp.lt.u32.totalorder %s460_s9, %s604_s5 }
 0x1db   :  { %p466_p7 = pnand %p464_p6, %p461_p5 }
 0x1dd   :  { %469 = shalt.err (!%p466_p7)
}
 0x1de   :  { %s476_s14 = smov 128   ;;  %s477_s15 = smov 8  }
 0x1df   :  { %345 = dma.vmem_to_hbm [thread:$0]  %s340_s7, 256, %s604_s5, [#allocation3], %s476_s14, %s476_s14, %s477_s15  }
 0x1e0   :  { %470 = dma.done.wait [#allocation3], 256  }
 0x1e1   :  { %471 = vsyncadd [#allocation3], 4294967040 }
 0x1e2   :  { %349 = vsyncpa [#allocation3], 1 }

</bundles_post_ra>
